<compile_context>
chip_gen: v7x
topology: tpu7x:2x2x1
jax: 0.10.0
libtpu: 0.0.40
codegen_flags: <defaults>
</compile_context>

<pallas_src>
import numpy as np

import jax
import jax.numpy as jnp
from jax import lax
from jax.experimental import pallas as pl
from jax.experimental.pallas import tpu as pltpu

# ----------------------------- static configuration -----------------------------
B = 2          # batch
C_IN = 4       # in_channels
LEN = 48       # args.length == input length
K = 5          # front conv kernel
S = 2          # front conv stride
HEAD = 1       # args.head
D = 16         # agca.d
EPS = 1e-5

C4 = 4 * C_IN                      # 16
L1 = (LEN - K) // S + 1            # 22  (front conv output length)
POOL_OUT = LEN // S                # 24  (AdaptiveMaxPool1d target)
MID = POOL_OUT // 6                # 4   (Linear hidden)
L_OUT = LEN // 4                   # 12  (final length)
HD = HEAD * D                      # 16
DW = 2 * L1 - 1                    # 43  (width of the shifted slices used by the in-kernel conv)
BC = B * C4                        # 32  (batch-stacked channel rows)
BL = B * L_OUT                     # 24  (batch-stacked output columns)
SLAB_W = 32                        # constant-slab lane width (>= max constant width)


# ----------------------------- small math helpers (kernel & reference) -----------------------------
def _hsigmoid(x):
    return jnp.clip(x + 3.0, 0.0, 6.0) / 6.0


def _hswish(x):
    return x * _hsigmoid(x)


# ----------------------------- host-side constant builders (run once, outside jit) -----------------------------
def _pool_gather_mats(l_in, l_out):
    """AdaptiveMaxPool1d windows (all of size <= 2 here) as two 0/1 column-gather matrices."""
    g1 = np.zeros((l_in, l_out), np.float32)
    g2 = np.zeros((l_in, l_out), np.float32)
    for j in range(l_out):
        s = (j * l_in) // l_out
        e = -(-((j + 1) * l_in) // l_out)
        assert 1 <= e - s <= 2, "gather-based pool assumes windows of size <= 2"
        g1[s, j] = 1.0
        g2[e - 1, j] = 1.0
    return g1, g2


def _perm_groups(hd, l_out):
    """Factor OT[i, j] = v_flat[i*l_out + j]  (v_flat = row-major flatten of v (l_out, hd))
    into a small sum of 0/1 row/column maps:  OT = sum_g A_g @ v @ B_g."""
    groups = []
    svals = sorted({(i * l_out) % hd for i in range(hd)})
    for s in svals:
        for wrap in (0, 1):
            A = np.zeros((hd, l_out), np.float32)   # target row i  -> source row ll
            Bm = np.zeros((hd, l_out), np.float32)  # source col dd -> target col j
            for i in range(hd):
                if (i * l_out) % hd != s:
                    continue
                ll = (i * l_out) // hd + wrap
                if ll < l_out:
                    A[i, ll] = 1.0
            for j in range(l_out):
                dd = s + j - (hd if wrap else 0)
                if 0 <= dd < hd:
                    Bm[dd, j] = 1.0
            if A.any() and Bm.any():
                groups.append((A, Bm))
    # sanity: the decomposition reproduces the torch .view raw-memory reshape exactly
    vtest = np.arange(l_out * hd, dtype=np.float32).reshape(l_out, hd)
    ot = sum(A @ vtest @ Bm for A, Bm in groups)
    assert np.array_equal(ot, vtest.reshape(hd, l_out))
    return groups


_GROUPS = _perm_groups(HD, L_OUT)
NG = len(_GROUPS)                  # 6


def _make_plan():
    """Row offsets (8-aligned) of every constant inside the single packed slab."""
    off = [0]

    def alloc(nrows):
        r = off[0]
        off[0] = r + ((nrows + 7) // 8) * 8
        return r

    plan = {
        "wf": alloc(K * BC),        # K blocks of (BC, 2*C_IN): per-tap blockdiag conv weights
        "g1": alloc(DW),            # (DW, POOL_OUT) pool gather (stride-2 folded in)
        "g2": alloc(DW),
        "w1t": alloc(POOL_OUT),     # (POOL_OUT, MID)
        "w2t": alloc(MID),          # (MID, L_OUT)
        "wcf": alloc(BC),           # (BC, BC) blockdiag channel_fuse
        "ppad": alloc(8 * NG),      # NG blocks of 8 rows, top C_IN rows = Wproj @ A_g
        "qbd": alloc(NG * BC),      # NG blocks of (BC, BL) blockdiag (Wv^T @ B_g)
        "bf": alloc(BC),            # (BC, 1)  front bias (BN folded), batch-tiled
        "acv": alloc(BC),           # (BC, 1)  conv-block BN scale
        "bcf": alloc(BC),           # (BC, 1)  channel_fuse bias (BN folded)
        "b2": alloc(BC),            # (BC, L_OUT) conv-block bias2+BN shift
        "b1": alloc(1),             # (1, MID)
        "bp": alloc(C_IN),          # (C_IN, 1) proj bias
    }
    return plan, off[0]


_P, SLAB_R = _make_plan()           # SLAB_R = 704 rows -> slab is (704, 32) f32 = 88 KiB


# =============================== the single fused Pallas kernel ===============================
def gcal_fused_kernel(x_ref, s_ref, o_ref):
    x = x_ref[...]                                            # (B*C_IN, LEN) = (8, 48)

    # ---- front Conv1d(k=5,s=2) + BN + ReLU + AdaptiveMaxPool1d(24), all folded ----
    # sum_k Wbd_k @ x[:, k:k+DW] evaluates every tap at every position for both batch elements
    # at once (batch block-diagonalised weights); the 0/1 gathers G1/G2 apply the stride-2
    # downsample and the <=2-wide adaptive-max windows in the same matmul.
    acc = jnp.dot(s_ref[_P["wf"]:_P["wf"] + BC, 0:2 * C_IN], x[:, 0:DW],
                  preferred_element_type=jnp.float32)
    for k in range(1, K):
        wk = s_ref[_P["wf"] + k * BC:_P["wf"] + (k + 1) * BC, 0:2 * C_IN]   # (32, 8)
        acc = acc + jnp.dot(wk, x[:, k:k + DW], preferred_element_type=jnp.float32)

    g1 = s_ref[_P["g1"]:_P["g1"] + DW, 0:POOL_OUT]
    g2 = s_ref[_P["g2"]:_P["g2"] + DW, 0:POOL_OUT]
    bf = s_ref[_P["bf"]:_P["bf"] + BC, 0:1]
    pooled = jnp.maximum(
        jnp.maximum(jnp.dot(acc, g1, preferred_element_type=jnp.float32),
                    jnp.dot(acc, g2, preferred_element_type=jnp.float32)) + bf,
        0.0)                                                  # (32, 24)

    # ---- conv block: Linear(24->4) + Dropout(id) + ReLU + Linear(4->12) + BN + h_sigmoid ----
    h = jnp.maximum(jnp.dot(pooled, s_ref[_P["w1t"]:_P["w1t"] + POOL_OUT, 0:MID],
                            preferred_element_type=jnp.float32)
                    + s_ref[_P["b1"]:_P["b1"] + 1, 0:MID], 0.0)             # (32, 4)
    h = jnp.dot(h, s_ref[_P["w2t"]:_P["w2t"] + MID, 0:L_OUT],
                preferred_element_type=jnp.float32)                          # (32, 12)
    y = _hsigmoid(h * s_ref[_P["acv"]:_P["acv"] + BC, 0:1]
                  + s_ref[_P["b2"]:_P["b2"] + BC, 0:L_OUT])                  # BN + bias folded

    # ---- agca.channel_fuse: 1x1 Conv + BN(folded) + h_swish (batch block-diag weight) ----
    z = _hswish(jnp.dot(s_ref[_P["wcf"]:_P["wcf"] + BC, 0:BC], y,
                        preferred_element_type=jnp.float32)
                + s_ref[_P["bcf"]:_P["bcf"] + BC, 0:1])                      # (32, 12)

    # ---- agca qkv / SDPA / view-permute / proj, exactly folded ----
    # softmax over the 1x1 logit == 1 -> attention output == V (q/k/LayerNorm dead);
    # the torch .view/.permute + proj Linear is Y_b = sum_g P_g @ z_b^T @ Q_g with fixed 0/1
    # maps.  Stage 1: one stacked NT dot_general for all groups & both batch elements;
    # stage 2: one tiny matmul per group against block-diag Q, accumulating (C_IN, B*L_OUT).
    ppad = s_ref[_P["ppad"]:_P["ppad"] + 8 * NG, 0:L_OUT]                    # (48, 12)
    t1 = lax.dot_general(ppad, z, (((1,), (1,)), ((), ())),
                         preferred_element_type=jnp.float32)                 # (48, 32)
    qbd0 = s_ref[_P["qbd"]:_P["qbd"] + BC, 0:BL]
    out = jnp.dot(t1[0:C_IN, :], qbd0, preferred_element_type=jnp.float32)   # (4, 24)
    for g in range(1, NG):
        qbd = s_ref[_P["qbd"] + g * BC:_P["qbd"] + (g + 1) * BC, 0:BL]       # (32, 24)
        out = out + jnp.dot(t1[8 * g:8 * g + C_IN, :], qbd,
                            preferred_element_type=jnp.float32)

    bp = s_ref[_P["bp"]:_P["bp"] + C_IN, 0:1]
    o_ref[...] = _hswish(out + bp)                            # one (4, B*L_OUT) store


# =============================== host-side (one-time) fold into the packed slab ===============================
def fold_params(P):
    """Fold eval-mode BatchNorms, stride-2 + pool gathers, batch block-diagonalisation and the
    attention view-permute + proj Linear into ONE packed constant slab (host side, runs once)."""
    slab = np.zeros((SLAB_R, SLAB_W), np.float32)

    # front conv + BN
    bnf = np.asarray(P["bn_front"])
    sf = bnf[0] / np.sqrt(bnf[3] + EPS)
    wf = np.asarray(P["w_front"])                                    # (C4, C_IN, K)
    bf = (np.asarray(P["b_front"]) - bnf[2]) * sf + bnf[1]           # (C4,)
    for k in range(K):
        wk = wf[:, :, k] * sf[:, None]                               # (C4, C_IN)
        blk = np.zeros((BC, 2 * C_IN), np.float32)
        blk[:C4, :C_IN] = wk
        blk[C4:, C_IN:] = wk
        slab[_P["wf"] + k * BC:_P["wf"] + (k + 1) * BC, :2 * C_IN] = blk
    slab[_P["bf"]:_P["bf"] + BC, 0] = np.tile(bf, B)

    # stride-2 downsample folded into the adaptive-max-pool gathers (exact: bias per-channel,
    # ReLU monotone, windows of size <= 2)
    dmat = np.zeros((DW, L1), np.float32)
    dmat[2 * np.arange(L1), np.arange(L1)] = 1.0
    g1, g2 = _pool_gather_mats(L1, POOL_OUT)
    slab[_P["g1"]:_P["g1"] + DW, :POOL_OUT] = dmat @ g1
    slab[_P["g2"]:_P["g2"] + DW, :POOL_OUT] = dmat @ g2

    # conv-block Linears + BN (Linear2 bias folded into the per-channel BN shift)
    slab[_P["w1t"]:_P["w1t"] + POOL_OUT, :MID] = np.asarray(P["w1"]).T
    slab[_P["b1"], :MID] = np.asarray(P["b1"])
    slab[_P["w2t"]:_P["w2t"] + MID, :L_OUT] = np.asarray(P["w2"]).T
    bnc = np.asarray(P["bn_conv"])
    ac = bnc[0] / np.sqrt(bnc[3] + EPS)
    bias2 = ac[:, None] * np.asarray(P["b2"])[None, :] + (bnc[1] - bnc[2] * ac)[:, None]  # (C4, L_OUT)
    slab[_P["acv"]:_P["acv"] + BC, 0] = np.tile(ac, B)
    slab[_P["b2"]:_P["b2"] + BC, :L_OUT] = np.tile(bias2, (B, 1))

    # channel_fuse 1x1 conv + BN, batch block-diagonalised
    bncf = np.asarray(P["bn_cf"])
    scf = bncf[0] / np.sqrt(bncf[3] + EPS)
    wcf = np.asarray(P["w_cf"])[:, :, 0] * scf[:, None]              # (C4, C4)
    bcf = (np.asarray(P["b_cf"]) - bncf[2]) * scf + bncf[1]
    blk = np.zeros((BC, BC), np.float32)
    blk[:C4, :C4] = wcf
    blk[C4:, C4:] = wcf
    slab[_P["wcf"]:_P["wcf"] + BC, :BC] = blk
    slab[_P["bcf"]:_P["bcf"] + BC, 0] = np.tile(bcf, B)

    # attention tail: att == V (softmax of 1x1 logit == 1); the .view/.permute + proj Linear
    # factors as Y_b = sum_g (Wproj @ A_g) @ z_b^T @ (Wv^T @ B_g).
    wproj = np.asarray(P["w_proj"])                                  # (C_IN, HD)
    wv = np.asarray(P["w_qkv"])[2 * HD:3 * HD, :]                    # (HD, C4)  V rows
    for g, (A, Bm) in enumerate(_GROUPS):
        pg = wproj @ A                                               # (C_IN, L_OUT)
        qg = wv.T @ Bm                                               # (C4, L_OUT)
        slab[_P["ppad"] + 8 * g:_P["ppad"] + 8 * g + C_IN, :L_OUT] = pg
        qbd = np.zeros((BC, BL), np.float32)
        qbd[:C4, :L_OUT] = qg
        qbd[C4:, L_OUT:] = qg
        slab[_P["qbd"] + g * BC:_P["qbd"] + (g + 1) * BC, :BL] = qbd
    slab[_P["bp"]:_P["bp"] + C_IN, 0] = np.asarray(P["b_proj"])

    return jnp.asarray(slab)


# =============================== host wrapper: one pallas_call, one grid step ===============================
def global_convolution_forward(x, slab):
    # (B, C_IN, LEN) -> (B*C_IN, LEN): free row-major reinterpretation (batch stacked on sublanes)
    x2d = x.reshape(B * C_IN, LEN)
    y = pl.pallas_call(
        gcal_fused_kernel,
        out_shape=jax.ShapeDtypeStruct((C_IN, BL), jnp.float32),
        grid=(1,),   # whole batch in one step; 2 input DMAs total (x + packed constant slab)
        in_specs=[pl.BlockSpec((B * C_IN, LEN), lambda i: (0, 0)),
                  pl.BlockSpec((SLAB_R, SLAB_W), lambda i: (0, 0))],
        out_specs=pl.BlockSpec((C_IN, BL), lambda i: (0, 0)),
        compiler_params=pltpu.CompilerParams(dimension_semantics=("arbitrary",)),
    )(x2d, slab)
    # columns are [batch0 | batch1]: (C_IN, B, L_OUT) -> (B, C_IN, L_OUT)  (96-float transpose)
    return y.reshape(C_IN, B, L_OUT).transpose(1, 0, 2)


# =============================== pure-JAX reference (mirrors the torch forward) ===============================
def _bn_ncl(x, bn):
    g, b, m, v = bn[0], bn[1], bn[2], bn[3]
    return (x - m[None, :, None]) * lax.rsqrt(v[None, :, None] + EPS) * g[None, :, None] + b[None, :, None]


def _adaptive_max_pool_ref(y, out_len):
    l_in = y.shape[-1]
    cols = []
    for i in range(out_len):
        s = (i * l_in) // out_len
        e = -(-((i + 1) * l_in) // out_len)
        cols.append(jnp.max(y[..., s:e], axis=-1, keepdims=True))
    return jnp.concatenate(cols, axis=-1)


def reference_forward(x, P):
    b, c, l = x.shape
    # front
    y = lax.conv_general_dilated(x, P["w_front"], window_strides=(S,), padding="VALID",
                                 dimension_numbers=("NCH", "OIH", "NCH"))
    y = y + P["b_front"][None, :, None]
    y = jnp.maximum(_bn_ncl(y, P["bn_front"]), 0.0)
    # conv block
    p = _adaptive_max_pool_ref(y, POOL_OUT)
    h = jnp.einsum("bcl,jl->bcj", p, P["w1"]) + P["b1"]
    h = jnp.maximum(h, 0.0)
    h = jnp.einsum("bcl,jl->bcj", h, P["w2"]) + P["b2"]
    y = _hsigmoid(_bn_ncl(h, P["bn_conv"]))
    # agca
    z = jnp.einsum("oc,bcl->bol", P["w_cf"][:, :, 0], y) + P["b_cf"][None, :, None]
    z = _hswish(_bn_ncl(z, P["bn_cf"]))
    yt = jnp.transpose(z, (0, 2, 1))
    qkv = jnp.einsum("blc,oc->blo", yt, P["w_qkv"]).reshape(b, L_OUT, 3, HEAD, D).transpose(2, 0, 1, 3, 4)
    q, k, v = qkv[0], qkv[1], qkv[2]

    def _ln(t):
        mu = jnp.mean(t, axis=-1, keepdims=True)
        var = jnp.mean((t - mu) ** 2, axis=-1, keepdims=True)
        return (t - mu) * lax.rsqrt(var + EPS) * P["ln_w"] + P["ln_b"]

    q, k = _ln(q), _ln(k)
    q = q.reshape(b, HEAD, -1)
    k = k.reshape(b, HEAD, -1)
    v = v.reshape(b, HEAD, -1)
    scale = 1.0 / jnp.sqrt(jnp.float32(q.shape[-1]))
    logits = jnp.einsum("bie,bje->bij", q, k) * scale
    att = jnp.einsum("bij,bje->bie", jax.nn.softmax(logits, axis=-1), v)
    out = att.reshape(b, HEAD, D, L_OUT).transpose(0, 3, 2, 1).reshape(b, L_OUT, HEAD * D)
    out = _hswish(out @ P["w_proj"].T + P["b_proj"])
    return jnp.transpose(out, (0, 2, 1))


# =============================== deterministic parameters ===============================
def init_params(key):
    ks = jax.random.split(key, 16)

    def w(k, shape, scale=0.1):
        return jax.random.normal(k, shape, jnp.float32) * scale

    def bn(k, ch):  # rows: gamma, beta, running_mean, running_var (non-trivial -> exercises folding)
        k1, k2, k3, k4 = jax.random.split(k, 4)
        gamma = 1.0 + 0.1 * jax.random.normal(k1, (ch,), jnp.float32)
        beta = 0.1 * jax.random.normal(k2, (ch,), jnp.float32)
        mean = 0.1 * jax.random.normal(k3, (ch,), jnp.float32)
        var = jax.random.uniform(k4, (ch,), jnp.float32, 0.5, 1.5)
        return jnp.stack([gamma, beta, mean, var])

    return {
        "w_front": w(ks[0], (C4, C_IN, K)),        # Conv1d(C_IN, 4C, k=5, s=2)
        "b_front": w(ks[1], (C4,)),
        "bn_front": bn(ks[11], C4),
        "w1": w(ks[2], (MID, POOL_OUT)),           # Linear(24, 4)
        "b1": w(ks[3], (MID,)),
        "w2": w(ks[4], (L_OUT, MID)),              # Linear(4, 12)
        "b2": w(ks[5], (L_OUT,)),
        "bn_conv": bn(ks[12], C4),
        "w_cf": w(ks[6], (C4, C4, 1)),             # channel_fuse Conv1d(16, 16, k=1)
        "b_cf": w(ks[7], (C4,)),
        "bn_cf": bn(ks[13], C4),
        "w_qkv": w(ks[8], (3 * HEAD * D, C4)),     # Linear(16, 48), no bias
        "ln_w": jnp.ones((D,), jnp.float32),       # LayerNorm (dead in forward: softmax(1x1)==1)
        "ln_b": jnp.zeros((D,), jnp.float32),
        "w_proj": w(ks[9], (C_IN, HEAD * D)),      # Linear(16, 4)
        "b_proj": w(ks[10], (C_IN,)),
    }


if __name__ == "__main__":
    key = jax.random.PRNGKey(0)
    pkey, xkey = jax.random.split(key)
    P = init_params(pkey)
    x = jax.random.normal(xkey, (B, C_IN, LEN), jnp.float32)

    slab = fold_params(P)                     # one-time host-side folding / packing (outside jit)
    fwd = jax.jit(global_convolution_forward)
    out = jax.block_until_ready(fwd(x, slab))

    ref = reference_forward(x, P)
    assert out.shape == (B, C_IN, L_OUT), out.shape
    if not bool(jnp.allclose(out, ref, rtol=1e-4, atol=1e-4)):
        raise RuntimeError(f"mismatch vs reference, max_err={float(jnp.max(jnp.abs(out - ref)))}")
    print("KERNEL_OK")
</pallas_src>

<mosaic_0001>
module attributes {stable_mosaic.version = 11 : i64} {
  func.func @gcal_fused_kernel(%arg0: i32, %arg1: memref<8x48xf32, #tpu.memory_space<vmem>>, %arg2: memref<704x32xf32, #tpu.memory_space<vmem>>, %arg3: memref<4x24xf32, #tpu.memory_space<vmem>>) attributes {dimension_semantics = [#tpu.dimension_semantics<arbitrary>], iteration_bounds = array<i64: 1>, scalar_prefetch = 0 : i64, scratch_operands = 0 : i64, tpu.core_type = #tpu.core_type<tc>, window_params = [{pipeline_mode = #tpu.pipeline_mode<synchronous>, transform_indices = @transform_0, window_bounds = array<i64: 8, 48>}, {pipeline_mode = #tpu.pipeline_mode<synchronous>, transform_indices = @transform_1, window_bounds = array<i64: 704, 32>}, {pipeline_mode = #tpu.pipeline_mode<synchronous>, transform_indices = @transform_2, window_bounds = array<i64: 4, 24>}]} {
    %c0 = arith.constant 0 : index
    %c0_0 = arith.constant 0 : index
    %0 = vector.load %arg1[%c0, %c0_0] : memref<8x48xf32, #tpu.memory_space<vmem>>, vector<8x48xf32>
    %c0_1 = arith.constant 0 : index
    %c0_2 = arith.constant 0 : index
    %1 = vector.load %arg2[%c0_1, %c0_2] : memref<704x32xf32, #tpu.memory_space<vmem>>, vector<32x8xf32>
    %2 = vector.extract_strided_slice %0 {offsets = [0, 0], sizes = [8, 43], strides = [1, 1]} : vector<8x48xf32> to vector<8x43xf32>
    %cst = arith.constant dense<0.000000e+00> : vector<32x43xf32>
    %3 = tpu.matmul %1, %2, %cst {dimension_numbers = #tpu.dot_dimension_numbers<[1], [0], [0], [1], [0, 0, 1, 1], [], []>} : vector<32x8xf32>, vector<8x43xf32>, vector<32x43xf32> -> vector<32x43xf32>
    %c32 = arith.constant 32 : index
    %c0_3 = arith.constant 0 : index
    %4 = vector.load %arg2[%c32, %c0_3] : memref<704x32xf32, #tpu.memory_space<vmem>>, vector<32x8xf32>
    %5 = vector.extract_strided_slice %0 {offsets = [0, 1], sizes = [8, 43], strides = [1, 1]} : vector<8x48xf32> to vector<8x43xf32>
    %cst_4 = arith.constant dense<0.000000e+00> : vector<32x43xf32>
    %6 = tpu.matmul %4, %5, %cst_4 {dimension_numbers = #tpu.dot_dimension_numbers<[1], [0], [0], [1], [0, 0, 1, 1], [], []>} : vector<32x8xf32>, vector<8x43xf32>, vector<32x43xf32> -> vector<32x43xf32>
    %7 = arith.addf %3, %6 : vector<32x43xf32>
    %c64 = arith.constant 64 : index
    %c0_5 = arith.constant 0 : index
    %8 = vector.load %arg2[%c64, %c0_5] : memref<704x32xf32, #tpu.memory_space<vmem>>, vector<32x8xf32>
    %9 = vector.extract_strided_slice %0 {offsets = [0, 2], sizes = [8, 43], strides = [1, 1]} : vector<8x48xf32> to vector<8x43xf32>
    %cst_6 = arith.constant dense<0.000000e+00> : vector<32x43xf32>
    %10 = tpu.matmul %8, %9, %cst_6 {dimension_numbers = #tpu.dot_dimension_numbers<[1], [0], [0], [1], [0, 0, 1, 1], [], []>} : vector<32x8xf32>, vector<8x43xf32>, vector<32x43xf32> -> vector<32x43xf32>
    %11 = arith.addf %7, %10 : vector<32x43xf32>
    %c96 = arith.constant 96 : index
    %c0_7 = arith.constant 0 : index
    %12 = vector.load %arg2[%c96, %c0_7] : memref<704x32xf32, #tpu.memory_space<vmem>>, vector<32x8xf32>
    %13 = vector.extract_strided_slice %0 {offsets = [0, 3], sizes = [8, 43], strides = [1, 1]} : vector<8x48xf32> to vector<8x43xf32>
    %cst_8 = arith.constant dense<0.000000e+00> : vector<32x43xf32>
    %14 = tpu.matmul %12, %13, %cst_8 {dimension_numbers = #tpu.dot_dimension_numbers<[1], [0], [0], [1], [0, 0, 1, 1], [], []>} : vector<32x8xf32>, vector<8x43xf32>, vector<32x43xf32> -> vector<32x43xf32>
    %15 = arith.addf %11, %14 : vector<32x43xf32>
    %c128 = arith.constant 128 : index
    %c0_9 = arith.constant 0 : index
    %16 = vector.load %arg2[%c128, %c0_9] : memref<704x32xf32, #tpu.memory_space<vmem>>, vector<32x8xf32>
    %17 = vector.extract_strided_slice %0 {offsets = [0, 4], sizes = [8, 43], strides = [1, 1]} : vector<8x48xf32> to vector<8x43xf32>
    %cst_10 = arith.constant dense<0.000000e+00> : vector<32x43xf32>
    %18 = tpu.matmul %16, %17, %cst_10 {dimension_numbers = #tpu.dot_dimension_numbers<[1], [0], [0], [1], [0, 0, 1, 1], [], []>} : vector<32x8xf32>, vector<8x43xf32>, vector<32x43xf32> -> vector<32x43xf32>
    %19 = arith.addf %15, %18 : vector<32x43xf32>
    %c160 = arith.constant 160 : index
    %c0_11 = arith.constant 0 : index
    %20 = vector.load %arg2[%c160, %c0_11] : memref<704x32xf32, #tpu.memory_space<vmem>>, vector<43x24xf32>
    %c208 = arith.constant 208 : index
    %c0_12 = arith.constant 0 : index
    %21 = vector.load %arg2[%c208, %c0_12] : memref<704x32xf32, #tpu.memory_space<vmem>>, vector<43x24xf32>
    %c560 = arith.constant 560 : index
    %c0_13 = arith.constant 0 : index
    %22 = vector.load %arg2[%c560, %c0_13] : memref<704x32xf32, #tpu.memory_space<vmem>>, vector<32x1xf32>
    %cst_14 = arith.constant dense<0.000000e+00> : vector<32x24xf32>
    %23 = tpu.matmul %19, %20, %cst_14 {dimension_numbers = #tpu.dot_dimension_numbers<[1], [0], [0], [1], [0, 0, 1, 1], [], []>} : vector<32x43xf32>, vector<43x24xf32>, vector<32x24xf32> -> vector<32x24xf32>
    %cst_15 = arith.constant dense<0.000000e+00> : vector<32x24xf32>
    %24 = tpu.matmul %19, %21, %cst_15 {dimension_numbers = #tpu.dot_dimension_numbers<[1], [0], [0], [1], [0, 0, 1, 1], [], []>} : vector<32x43xf32>, vector<43x24xf32>, vector<32x24xf32> -> vector<32x24xf32>
    %25 = arith.maximumf %23, %24 : vector<32x24xf32>
    %26 = vector.broadcast %22 : vector<32x1xf32> to vector<32x24xf32>
    %27 = arith.addf %25, %26 : vector<32x24xf32>
    %cst_16 = arith.constant 0.000000e+00 : f32
    %28 = vector.broadcast %cst_16 : f32 to vector<32x24xf32>
    %29 = arith.maximumf %27, %28 : vector<32x24xf32>
    %c256 = arith.constant 256 : index
    %c0_17 = arith.constant 0 : index
    %30 = vector.load %arg2[%c256, %c0_17] : memref<704x32xf32, #tpu.memory_space<vmem>>, vector<24x4xf32>
    %cst_18 = arith.constant dense<0.000000e+00> : vector<32x4xf32>
    %31 = tpu.matmul %29, %30, %cst_18 {dimension_numbers = #tpu.dot_dimension_numbers<[1], [0], [0], [1], [0, 0, 1, 1], [], []>} : vector<32x24xf32>, vector<24x4xf32>, vector<32x4xf32> -> vector<32x4xf32>
    %c688 = arith.constant 688 : index
    %c0_19 = arith.constant 0 : index
    %32 = vector.load %arg2[%c688, %c0_19] : memref<704x32xf32, #tpu.memory_space<vmem>>, vector<1x4xf32>
    %33 = vector.broadcast %32 : vector<1x4xf32> to vector<32x4xf32>
    %34 = arith.addf %31, %33 : vector<32x4xf32>
    %cst_20 = arith.constant 0.000000e+00 : f32
    %35 = vector.broadcast %cst_20 : f32 to vector<32x4xf32>
    %36 = arith.maximumf %34, %35 : vector<32x4xf32>
    %c280 = arith.constant 280 : index
    %c0_21 = arith.constant 0 : index
    %37 = vector.load %arg2[%c280, %c0_21] : memref<704x32xf32, #tpu.memory_space<vmem>>, vector<4x12xf32>
    %cst_22 = arith.constant dense<0.000000e+00> : vector<32x12xf32>
    %38 = tpu.matmul %36, %37, %cst_22 {dimension_numbers = #tpu.dot_dimension_numbers<[1], [0], [0], [1], [0, 0, 1, 1], [], []>} : vector<32x4xf32>, vector<4x12xf32>, vector<32x12xf32> -> vector<32x12xf32>
    %c592 = arith.constant 592 : index
    %c0_23 = arith.constant 0 : index
    %39 = vector.load %arg2[%c592, %c0_23] : memref<704x32xf32, #tpu.memory_space<vmem>>, vector<32x1xf32>
    %40 = vector.broadcast %39 : vector<32x1xf32> to vector<32x12xf32>
    %41 = arith.mulf %38, %40 : vector<32x12xf32>
    %c656 = arith.constant 656 : index
    %c0_24 = arith.constant 0 : index
    %42 = vector.load %arg2[%c656, %c0_24] : memref<704x32xf32, #tpu.memory_space<vmem>>, vector<32x12xf32>
    %43 = arith.addf %41, %42 : vector<32x12xf32>
    %cst_25 = arith.constant 3.000000e+00 : f32
    %44 = vector.broadcast %cst_25 : f32 to vector<32x12xf32>
    %45 = arith.addf %43, %44 : vector<32x12xf32>
    %cst_26 = arith.constant 0.000000e+00 : f32
    %cst_27 = arith.constant 6.000000e+00 : f32
    %46 = vector.broadcast %cst_26 : f32 to vector<32x12xf32>
    %47 = arith.maximumf %46, %45 : vector<32x12xf32>
    %48 = vector.broadcast %cst_27 : f32 to vector<32x12xf32>
    %49 = arith.minimumf %48, %47 : vector<32x12xf32>
    %cst_28 = arith.constant 6.000000e+00 : f32
    %50 = vector.broadcast %cst_28 : f32 to vector<32x12xf32>
    %51 = arith.divf %49, %50 : vector<32x12xf32>
    %c288 = arith.constant 288 : index
    %c0_29 = arith.constant 0 : index
    %52 = vector.load %arg2[%c288, %c0_29] : memref<704x32xf32, #tpu.memory_space<vmem>>, vector<32x32xf32>
    %cst_30 = arith.constant dense<0.000000e+00> : vector<32x12xf32>
    %53 = tpu.matmul %52, %51, %cst_30 {dimension_numbers = #tpu.dot_dimension_numbers<[1], [0], [0], [1], [0, 0, 1, 1], [], []>} : vector<32x32xf32>, vector<32x12xf32>, vector<32x12xf32> -> vector<32x12xf32>
    %c624 = arith.constant 624 : index
    %c0_31 = arith.constant 0 : index
    %54 = vector.load %arg2[%c624, %c0_31] : memref<704x32xf32, #tpu.memory_space<vmem>>, vector<32x1xf32>
    %55 = vector.broadcast %54 : vector<32x1xf32> to vector<32x12xf32>
    %56 = arith.addf %53, %55 : vector<32x12xf32>
    %cst_32 = arith.constant 3.000000e+00 : f32
    %57 = vector.broadcast %cst_32 : f32 to vector<32x12xf32>
    %58 = arith.addf %56, %57 : vector<32x12xf32>
    %cst_33 = arith.constant 0.000000e+00 : f32
    %cst_34 = arith.constant 6.000000e+00 : f32
    %59 = vector.broadcast %cst_33 : f32 to vector<32x12xf32>
    %60 = arith.maximumf %59, %58 : vector<32x12xf32>
    %61 = vector.broadcast %cst_34 : f32 to vector<32x12xf32>
    %62 = arith.minimumf %61, %60 : vector<32x12xf32>
    %cst_35 = arith.constant 6.000000e+00 : f32
    %63 = vector.broadcast %cst_35 : f32 to vector<32x12xf32>
    %64 = arith.divf %62, %63 : vector<32x12xf32>
    %65 = arith.mulf %56, %64 : vector<32x12xf32>
    %c320 = arith.constant 320 : index
    %c0_36 = arith.constant 0 : index
    %66 = vector.load %arg2[%c320, %c0_36] : memref<704x32xf32, #tpu.memory_space<vmem>>, vector<48x12xf32>
    %cst_37 = arith.constant dense<0.000000e+00> : vector<48x32xf32>
    %67 = tpu.matmul %66, %65, %cst_37 {dimension_numbers = #tpu.dot_dimension_numbers<[1], [1], [0], [0], [0, 0, 1, 0], [], []>} : vector<48x12xf32>, vector<32x12xf32>, vector<48x32xf32> -> vector<48x32xf32>
    %c368 = arith.constant 368 : index
    %c0_38 = arith.constant 0 : index
    %68 = vector.load %arg2[%c368, %c0_38] : memref<704x32xf32, #tpu.memory_space<vmem>>, vector<32x24xf32>
    %69 = vector.extract_strided_slice %67 {offsets = [0, 0], sizes = [4, 32], strides = [1, 1]} : vector<48x32xf32> to vector<4x32xf32>
    %cst_39 = arith.constant dense<0.000000e+00> : vector<4x24xf32>
    %70 = tpu.matmul %69, %68, %cst_39 {dimension_numbers = #tpu.dot_dimension_numbers<[1], [0], [0], [1], [0, 0, 1, 1], [], []>} : vector<4x32xf32>, vector<32x24xf32>, vector<4x24xf32> -> vector<4x24xf32>
    %c400 = arith.constant 400 : index
    %c0_40 = arith.constant 0 : index
    %71 = vector.load %arg2[%c400, %c0_40] : memref<704x32xf32, #tpu.memory_space<vmem>>, vector<32x24xf32>
    %72 = vector.extract_strided_slice %67 {offsets = [8, 0], sizes = [4, 32], strides = [1, 1]} : vector<48x32xf32> to vector<4x32xf32>
    %cst_41 = arith.constant dense<0.000000e+00> : vector<4x24xf32>
    %73 = tpu.matmul %72, %71, %cst_41 {dimension_numbers = #tpu.dot_dimension_numbers<[1], [0], [0], [1], [0, 0, 1, 1], [], []>} : vector<4x32xf32>, vector<32x24xf32>, vector<4x24xf32> -> vector<4x24xf32>
    %74 = arith.addf %70, %73 : vector<4x24xf32>
    %c432 = arith.constant 432 : index
    %c0_42 = arith.constant 0 : index
    %75 = vector.load %arg2[%c432, %c0_42] : memref<704x32xf32, #tpu.memory_space<vmem>>, vector<32x24xf32>
    %76 = vector.extract_strided_slice %67 {offsets = [16, 0], sizes = [4, 32], strides = [1, 1]} : vector<48x32xf32> to vector<4x32xf32>
    %cst_43 = arith.constant dense<0.000000e+00> : vector<4x24xf32>
    %77 = tpu.matmul %76, %75, %cst_43 {dimension_numbers = #tpu.dot_dimension_numbers<[1], [0], [0], [1], [0, 0, 1, 1], [], []>} : vector<4x32xf32>, vector<32x24xf32>, vector<4x24xf32> -> vector<4x24xf32>
    %78 = arith.addf %74, %77 : vector<4x24xf32>
    %c464 = arith.constant 464 : index
    %c0_44 = arith.constant 0 : index
    %79 = vector.load %arg2[%c464, %c0_44] : memref<704x32xf32, #tpu.memory_space<vmem>>, vector<32x24xf32>
    %80 = vector.extract_strided_slice %67 {offsets = [24, 0], sizes = [4, 32], strides = [1, 1]} : vector<48x32xf32> to vector<4x32xf32>
    %cst_45 = arith.constant dense<0.000000e+00> : vector<4x24xf32>
    %81 = tpu.matmul %80, %79, %cst_45 {dimension_numbers = #tpu.dot_dimension_numbers<[1], [0], [0], [1], [0, 0, 1, 1], [], []>} : vector<4x32xf32>, vector<32x24xf32>, vector<4x24xf32> -> vector<4x24xf32>
    %82 = arith.addf %78, %81 : vector<4x24xf32>
    %c496 = arith.constant 496 : index
    %c0_46 = arith.constant 0 : index
    %83 = vector.load %arg2[%c496, %c0_46] : memref<704x32xf32, #tpu.memory_space<vmem>>, vector<32x24xf32>
    %84 = vector.extract_strided_slice %67 {offsets = [32, 0], sizes = [4, 32], strides = [1, 1]} : vector<48x32xf32> to vector<4x32xf32>
    %cst_47 = arith.constant dense<0.000000e+00> : vector<4x24xf32>
    %85 = tpu.matmul %84, %83, %cst_47 {dimension_numbers = #tpu.dot_dimension_numbers<[1], [0], [0], [1], [0, 0, 1, 1], [], []>} : vector<4x32xf32>, vector<32x24xf32>, vector<4x24xf32> -> vector<4x24xf32>
    %86 = arith.addf %82, %85 : vector<4x24xf32>
    %c528 = arith.constant 528 : index
    %c0_48 = arith.constant 0 : index
    %87 = vector.load %arg2[%c528, %c0_48] : memref<704x32xf32, #tpu.memory_space<vmem>>, vector<32x24xf32>
    %88 = vector.extract_strided_slice %67 {offsets = [40, 0], sizes = [4, 32], strides = [1, 1]} : vector<48x32xf32> to vector<4x32xf32>
    %cst_49 = arith.constant dense<0.000000e+00> : vector<4x24xf32>
    %89 = tpu.matmul %88, %87, %cst_49 {dimension_numbers = #tpu.dot_dimension_numbers<[1], [0], [0], [1], [0, 0, 1, 1], [], []>} : vector<4x32xf32>, vector<32x24xf32>, vector<4x24xf32> -> vector<4x24xf32>
    %90 = arith.addf %86, %89 : vector<4x24xf32>
    %c696 = arith.constant 696 : index
    %c0_50 = arith.constant 0 : index
    %91 = vector.load %arg2[%c696, %c0_50] : memref<704x32xf32, #tpu.memory_space<vmem>>, vector<4x1xf32>
    %92 = vector.broadcast %91 : vector<4x1xf32> to vector<4x24xf32>
    %93 = arith.addf %90, %92 : vector<4x24xf32>
    %cst_51 = arith.constant 3.000000e+00 : f32
    %94 = vector.broadcast %cst_51 : f32 to vector<4x24xf32>
    %95 = arith.addf %93, %94 : vector<4x24xf32>
    %cst_52 = arith.constant 0.000000e+00 : f32
    %cst_53 = arith.constant 6.000000e+00 : f32
    %96 = vector.broadcast %cst_52 : f32 to vector<4x24xf32>
    %97 = arith.maximumf %96, %95 : vector<4x24xf32>
    %98 = vector.broadcast %cst_53 : f32 to vector<4x24xf32>
    %99 = arith.minimumf %98, %97 : vector<4x24xf32>
    %cst_54 = arith.constant 6.000000e+00 : f32
    %100 = vector.broadcast %cst_54 : f32 to vector<4x24xf32>
    %101 = arith.divf %99, %100 : vector<4x24xf32>
    %102 = arith.mulf %93, %101 : vector<4x24xf32>
    %c0_55 = arith.constant 0 : index
    %c0_56 = arith.constant 0 : index
    %103 = vector.load %arg3[%c0_55, %c0_56] : memref<4x24xf32, #tpu.memory_space<vmem>>, vector<4x24xf32>
    tpu.vector_store %arg3[%c0_55, %c0_56], %102 {strides = array<i32>} : memref<4x24xf32, #tpu.memory_space<vmem>>, vector<4x24xf32>,
    return
  }
  func.func @transform_0(%arg0: i32) -> (i32, i32) {
    %c0_i32 = arith.constant 0 : i32
    %c0_i32_0 = arith.constant 0 : i32
    %c0_i32_1 = arith.constant 0 : i32
    return %c0_i32, %c0_i32_0 : i32, i32
  }
  func.func @transform_1(%arg0: i32) -> (i32, i32) {
    %c0_i32 = arith.constant 0 : i32
    %c0_i32_0 = arith.constant 0 : i32
    %c0_i32_1 = arith.constant 0 : i32
    return %c0_i32, %c0_i32_0 : i32, i32
  }
  func.func @transform_2(%arg0: i32) -> (i32, i32) {
    %c0_i32 = arith.constant 0 : i32
    %c0_i32_0 = arith.constant 0 : i32
    %c0_i32_1 = arith.constant 0 : i32
    return %c0_i32, %c0_i32_0 : i32, i32
  }
}

</mosaic_0001>

<bundles_post_ra>
// kernel: global_convolution_forward.1
= control target key start
LH: loop header
LB: loop body
LE: loop exit
PB: predicated region body
PF: predicated region fallthrough
CT: control target
= control target key end

     0   :  { %vm24_vm0 = vcmask 64512   ;;  %s2282_s13 = smov 127   ;;  %s2283_s14 = smov 125   ;;  %vm572_vm1 = vcmask 1042432   ;;  %vm2286_vm2 = vmmov 1   ;;  %v2287_v40 = vmov 0   ;;  %s2660_s0 = inlined_call_operand.vmem [shape: f32[8,48], index: 0, kind: input, shape index: {}]   ;;  %s2661_s1 = inlined_call_operand.vmem [shape: f32[704,32], index: 1, kind: input, shape index: {}]   ;;  %s2662_s2 = inlined_call_operand.vmem [shape: f32[4,24], index: 2, kind: output, shape index: {}]  }
   0x1   :  { %v11_v0 = vld [vmem:[%s2660_s0] sm:$0xff]  ;;  %s2284_s15 = smov 126   ;;  %s2285_s16 = smov 124   ;;  %v544_v3 = vld [vmem:[%s2661_s1 + $0xa8] sm:$0xff]  ;;  %v545_v4 = vld [vmem:[%s2661_s1 + $0xb0] sm:$0xff]  ;;  %2281 = vset.pattern.permute.xlu1 %v2287_v40  ;;  %2280 = vset.pattern.permute.xlu0 %v2287_v40  ;;  %vm559_vm4 = vcmask 351232  }
   0x2   :  { %v16_v1 = vld [vmem:[%s2661_s1 + $0x20] sm:$0xff]  ;;  %21 = vrot.lane.b32.xlu0 %v11_v0, %s2282_s13  ;;  %331 = vrot.lane.b32.xlu1 %v11_v0, %s2283_s14  ;;  %v546_v6 = vld [vmem:[%s2661_s1 + $0xb8] sm:$0xff]  ;;  %vm2331_vm3 = vmpackc.low %vm572_vm1, %vm2286_vm2  ;;  %vm905_vm5 = vcmask 1043456   ;;  %vm789_vm6 = vcmask 195584   ;;  %vm892_vm7 = vcmask 31744   ;;  %vm1075_vm8 = vcmask 261120  }
   0x3   :  { %1976 = vmatprep.mubr.msk.f32.mxu0 %vm24_vm0, %v16_v1  ;;  %v543_v2 = vld [vmem:[%s2661_s1 + $0xa0] sm:$0xff]  ;;  %v2171_v7 = vpack.c.bf16 %v546_v6, %v545_v4  ;;  %v548_v9 = vld [vmem:[%s2661_s1 + $0xc8] sm:$0x7]  ;;  %v18_v14 = vld [vmem:[%s2661_s1 + $0x30] sm:$0xff]  ;;  %vm1199_vm9 = vcmask 97280   ;;  %vm2289_vm11 = vmmov 0  }
   0x4   :  { %v2167_v5 = vpack.c.bf16 %v544_v3, %v543_v2  ;;  %v547_v8 = vld [vmem:[%s2661_s1 + $0xc0] sm:$0xff]  ;;  %v17_v13 = vld [vmem:[%s2661_s1 + $0x28] sm:$0xff]  ;;  %v19_v15 = vld [vmem:[%s2661_s1 + $0x38] sm:$0xff]  ;;  %vm1803_vm12 = vcmask 191488  }
   0x5   :  { %v2175_v10 = vpack.c.bf16 %v548_v9, %v547_v8  ;;  %v12_v17 = vld [vmem:[%s2661_s1] sm:$0xff]  ;;  %v13_v18 = vld [vmem:[%s2661_s1 + $0x8] sm:$0xff]  ;;  %v14_v19 = vld [vmem:[%s2661_s1 + $0x10] sm:$0xff] }
   0x6   :  { %223 = vrot.lane.b32.xlu0 %v11_v0, %s2284_s15  ;;  %439 = vrot.lane.b32.xlu1 %v11_v0, %s2285_s16  ;;  %v15_v21 = vld [vmem:[%s2661_s1 + $0x18] sm:$0xff]  ;;  %v219_v22 = vld [vmem:[%s2661_s1 + $0x40] sm:$0xff]  ;;  %vm2208_vm10 = vmpackc.low %vm1199_vm9, %vm1199_vm9 }
   0x7   :  { %2168 = vmatprep.subr.bf16.mxu1 %v2167_v5  ;;  %v220_v23 = vld [vmem:[%s2661_s1 + $0x48] sm:$0xff]  ;;  %v221_v24 = vld [vmem:[%s2661_s1 + $0x50] sm:$0xff]  ;;  %v222_v26 = vld [vmem:[%s2661_s1 + $0x58] sm:$0xff] }
   0x8   :  { %2170 = vmatpush3.bf16.msra.mxu1 %v2167_v5  ;;  %v327_v27 = vld [vmem:[%s2661_s1 + $0x60] sm:$0xff]  ;;  %v328_v28 = vld [vmem:[%s2661_s1 + $0x68] sm:$0xff]  ;;  %v329_v29 = vld [vmem:[%s2661_s1 + $0x70] sm:$0xff] }
   0x9   :  { %2172 = vmatprep.subr.bf16.mxu1 %v2171_v7  ;;  %v330_v30 = vld [vmem:[%s2661_s1 + $0x78] sm:$0xff]  ;;  %v435_v31 = vld [vmem:[%s2661_s1 + $0x80] sm:$0xff]  ;;  %v436_v32 = vld [vmem:[%s2661_s1 + $0x88] sm:$0xff] }
   0xa   :  { %v437_v33 = vld [vmem:[%s2661_s1 + $0x90] sm:$0xff]  ;;  %v438_v34 = vld [vmem:[%s2661_s1 + $0x98] sm:$0xff]  ;;  %v557_v41 = vld [vmem:[%s2661_s1 + $0x240] sm:$0xff] }
   0xb   :  { %v549_v35 = vld [vmem:[%s2661_s1 + $0xd0] sm:$0xff]  ;;  %v550_v36 = vld [vmem:[%s2661_s1 + $0xd8] sm:$0xff]  ;;  %v558_v42 = vld [vmem:[%s2661_s1 + $0x248] sm:$0xff] }
   0xc   :  { %2174 = vmatpush3.bf16.msra.mxu1 %v2171_v7  ;;  %v2181_v37 = vpack.c.bf16 %v550_v36, %v549_v35  ;;  %v556_v38 = vld [vmem:[%s2661_s1 + $0x238] sm:$0xff]  ;;  %v555_v39 = vld [vmem:[%s2661_s1 + $0x230] sm:$0xff]  ;;  %v996_v45 = vld [vmem:[%s2661_s1 + $0x260] sm:$0xff] }
   0xd   :  { %2177 = vmatprep.subr.msk.bf16.mxu1 %vm2331_vm3, %v2175_v10  ;;  %760 = vperm.xlu1 %2281, %v556_v38   ;;  %v994_v43 = vld [vmem:[%s2661_s1 + $0x250] sm:$0xff]  ;;  %v995_v44 = vld [vmem:[%s2661_s1 + $0x258] sm:$0xff]  ;;  %v997_v46 = vld [vmem:[%s2661_s1 + $0x268] sm:$0xff] }
   0xe   :  { %755 = vperm.xlu0 %2280, %v555_v39   ;;  %v1051_v47 = vld [vmem:[%s2661_s1 + $0x270] sm:$0xff]  ;;  %v1052_v48 = vld [vmem:[%s2661_s1 + $0x278] sm:$0xff]  ;;  %v1053_v49 = vld [vmem:[%s2661_s1 + $0x280] sm:$0xff] }
   0xf   :  { %v1054_v50 = vld [vmem:[%s2661_s1 + $0x288] sm:$0xff]  ;;  %v1791_v51 = vld [vmem:[%s2661_s1 + $0x2b8] sm:$0xf]  ;;  %v551_v52 = vld [vmem:[%s2661_s1 + $0xe0] sm:$0xff] }
  0x10   :  { %2180 = vmatpush3.bf16.msk.msra.mxu1 %vm2331_vm3, %v2175_v10  ;;  %v552_v53 = vld [vmem:[%s2661_s1 + $0xe8] sm:$0xff]  ;;  %v553_v57 = vld [vmem:[%s2661_s1 + $0xf0] sm:$0xff]  ;;  %v554_v58 = vld [vmem:[%s2661_s1 + $0xf8] sm:$0x7] }
  0x11   :  { %2182 = vmatprep.subr.bf16.mxu1 %v2181_v37  ;;  %765 = vperm.xlu1 %2281, %v557_v41   ;;  %v2185_v56 = vpack.c.bf16 %v552_v53, %v551_v52  ;;  %v2189_v61 = vpack.c.bf16 %v554_v58, %v553_v57  ;;  %v781_v62 = vld [vmem:[%s2661_s1 + $0x100] sm:$0xff]  ;;  %v782_v63 = vld [vmem:[%s2661_s1 + $0x108] sm:$0xff]  ;;  %v783_v1 = vld [vmem:[%s2661_s1 + $0x110] sm:$0xff] }
  0x12   :  { %770 = vperm.xlu0 %2280, %v558_v42   ;;  %v891_v2 = vld [vmem:[%s2661_s1 + $0x118] sm:$0xf]  ;;  %v1047_v40 = vld [vmem:[%s2661_s1 + $0x120] sm:$0xff]  ;;  %v1025_v53 = vld [vmem:[%s2661_s1 + $0x2a8] sm:$0xff] }
  0x13   :  { %v1024_v58 = vld [vmem:[%s2661_s1 + $0x2a0] sm:$0xff] }
  0x15   :  { %1000 = vperm.xlu1 %2281, %v994_v43  }
  0x16   :  { %1005 = vperm.xlu0 %2280, %v995_v44   ;;  %v1023_v44 = vld [vmem:[%s2661_s1 + $0x298] sm:$0xff] }
  0x19   :  { %1010 = vperm.xlu1 %2281, %v996_v45  }
  0x1a   :  { %1015 = vperm.xlu0 %2280, %v997_v46  }
  0x1d   :  { %1057 = vperm.xlu1 %2281, %v1051_v47   ;;  %v1022_v47 = vld [vmem:[%s2661_s1 + $0x290] sm:$0xff] }
  0x1e   :  { %1062 = vperm.xlu0 %2280, %v1052_v48  }
  0x21   :  { %1067 = vperm.xlu1 %2281, %v1053_v49  }
  0x22   :  { %1072 = vperm.xlu0 %2280, %v1054_v50  }
  0x25   :  { %1794 = vperm.xlu1 %2281, %v1791_v51  }
  0x74   :  { %v22_v12 = vpop.permute.xlu0 %21  ;;  %v332_v20 = vpop.permute.xlu1 %331 }
  0x75   :  { %1974 = vmatprep.subr.mxu0 %v22_v12 }
  0x76   :  { %1975 = vmatpush3.msra.mxu0 %v22_v12 }
  0x77   :  { %1977 = vmatmul.mubr.msk.f32.vlgmr.msra.gmra.mrb[0].mxu0 %vm24_vm0, %v17_v13  ;;  %1982 = vmatprep.subr.mxu0 %v11_v0 }
  0x78   :  { %1983 = vmatpush3.msra.mxu0 %v11_v0  ;;  %1979 = vmatprep.mubr.msk.f32.mxu0 %vm24_vm0, %v18_v14  ;;  %v224_v16 = vpop.permute.xlu0 %223  ;;  %v440_v25 = vpop.permute.xlu1 %439  ;;  %v2195_v0 = vpack.c.bf16 %v782_v63, %v781_v62 }
  0x79   :  { %1990 = vmatprep.subr.mxu0 %v224_v16 }
  0x7b   :  { %1980 = vmatmul.mubr.msk.f32.gmra.mrb[2].mxu0 %vm24_vm0, %v19_v15 }
  0x7c   :  { %1984 = vmatprep.mubr.msk.f32.mxu0 %vm24_vm0, %v12_v17 }
  0x7f   :  { %1985 = vmatmul.mubr.msk.f32.vlgmr.msra.gmra.mrb[0].mxu0 %vm24_vm0, %v13_v18 }
  0x80   :  { %1991 = vmatpush3.msra.mxu0 %v224_v16  ;;  %1987 = vmatprep.mubr.msk.f32.mxu0 %vm24_vm0, %v14_v19 }
  0x81   :  { %1998 = vmatprep.subr.mxu0 %v332_v20 }
  0x83   :  { %1988 = vmatmul.mubr.msk.f32.gmra.mrb[2].mxu0 %vm24_vm0, %v15_v21 }
  0x84   :  { %1992 = vmatprep.mubr.msk.f32.mxu0 %vm24_vm0, %v219_v22 }
  0x87   :  { %1993 = vmatmul.mubr.msk.f32.vlgmr.msra.gmra.mrb[0].mxu0 %vm24_vm0, %v220_v23 }
  0x88   :  { %1999 = vmatpush3.msra.mxu0 %v332_v20  ;;  %1995 = vmatprep.mubr.msk.f32.mxu0 %vm24_vm0, %v221_v24 }
  0x89   :  { %2006 = vmatprep.subr.mxu0 %v440_v25 }
  0x8b   :  { %1996 = vmatmul.mubr.msk.f32.gmra.mrb[2].mxu0 %vm24_vm0, %v222_v26 }
  0x8c   :  { %2000 = vmatprep.mubr.msk.f32.mxu0 %vm24_vm0, %v327_v27  ;;  %v761_v9 = vpop.permute.xlu1 %760  ;;  %v1839_v27 = vld [vmem:[%s2661_s1 + $0x2b0] ss:$0 sm:$0xff] }
  0x8d   :  { %v756_v7 = vpop.permute.xlu0 %755 }
  0x8f   :  { %2001 = vmatmul.mubr.msk.f32.vlgmr.msra.gmra.mrb[0].mxu0 %vm24_vm0, %v328_v28 }
  0x90   :  { %2007 = vmatpush3.msra.mxu0 %v440_v25  ;;  %2003 = vmatprep.mubr.msk.f32.mxu0 %vm24_vm0, %v329_v29  ;;  %v766_v21 = vpop.permute.xlu1 %765 }
  0x91   :  { %v771_v18 = vpop.permute.xlu0 %770 }
  0x93   :  { %2004 = vmatmul.mubr.msk.f32.gmra.mrb[2].mxu0 %vm24_vm0, %v330_v30 }
  0x94   :  { %2008 = vmatprep.mubr.msk.f32.mxu0 %vm24_vm0, %v435_v31  ;;  %v1001_v42 = vpop.permute.xlu1 %1000 }
  0x95   :  { %v1006_v41 = vpop.permute.xlu0 %1005 }
  0x97   :  { %2009 = vmatmul.mubr.msk.f32.vlgmr.msra.gmra.mrb[0].mxu0 %vm24_vm0, %v436_v32 }
  0x98   :  { %2011 = vmatprep.mubr.msk.f32.mxu0 %vm24_vm0, %v437_v33 }
  0x99   :  { %v1016_v50 = vpop.permute.xlu0 %1015 }
  0x9b   :  { %2012 = vmatmul.mubr.msk.f32.gmra.mrb[2].mxu0 %vm24_vm0, %v438_v34 }
  0x9c   :  { %2078 = vmatprep.mubr.msk.f32.mxu0 %vm1075_vm8, %v1047_v40 }
 0x16a   :  { %v2010_v54 = vpop.f32.mrb[0].mxu0 }
 0x16b   :  { %v520_v55 = vpop.f32.mrb[1].mxu0 }
 0x16c   :  { %2026 = vmatprep.mubr.msk.f32.mxu1 %vm559_vm4, %v520_v55 }
 0x16d   :  { %2027 = vmatmul.mubr.msk.f32.vlgmr.msra.gmra.mrb[0].mxu1 %vm559_vm4, %v2010_v54 }
 0x16e   :  { %2184 = vmatpush3.bf16.msra.mxu1 %v2181_v37  ;;  %v2013_v59 = vpop.f32.mrb[2].mxu0 }
 0x16f   :  { %v530_v60 = vpop.f32.mrb[3].mxu0  ;;  %2186 = vmatprep.subr.bf16.mxu1 %v2185_v56 }
 0x170   :  { %2029 = vmatprep.mubr.msk.f32.mxu1 %vm559_vm4, %v530_v60 }
 0x171   :  { %2030 = vmatmul.mubr.msk.f32.gmra.mrb[2].mxu1 %vm559_vm4, %v2013_v59 }
 0x172   :  { %2188 = vmatpush3.bf16.msra.mxu1 %v2185_v56  ;;  %2044 = vmatprep.mubr.msk.f32.mxu1 %vm559_vm4, %v520_v55 }
 0x173   :  { %2191 = vmatprep.subr.msk.bf16.mxu1 %vm2331_vm3, %v2189_v61 }
 0x176   :  { %2194 = vmatpush3.bf16.msk.msra.mxu1 %vm2331_vm3, %v2189_v61 }
 0x177   :  { %2196 = vmatprep.subr.bf16.mxu1 %v2195_v0 }
 0x179   :  { %2045 = vmatmul.mubr.msk.f32.vlgmr.msra.gmra.mrb[4].mxu1 %vm559_vm4, %v2010_v54  ;;  %v1011_v54 = vpop.permute.xlu1 %1010 }
 0x17a   :  { %2047 = vmatprep.mubr.msk.f32.mxu1 %vm559_vm4, %v530_v60  ;;  %2198 = vmatpush3.bf16.msra.mxu1 %v2195_v0 }
 0x17b   :  { %2054 = vmatprep.subr.mxu1 %v783_v1 }
 0x17d   :  { %2048 = vmatmul.mubr.msk.f32.gmra.mrb[6].mxu1 %vm559_vm4, %v2013_v59 }
 0x17e   :  { %2055 = vmatpush3.msra.mxu1 %v783_v1 }
 0x17f   :  { %2062 = vmatprep.subr.msk.mxu1 %vm905_vm5, %v891_v2 }
 0x240   :  { %v2028_v3 = vpop.f32.mrb[0].mxu1 }
 0x241   :  { %v642_v4 = vpop.f32.mrb[1].mxu1 }
 0x244   :  { %v2031_v5 = vpop.f32.mrb[2].mxu1 }
 0x245   :  { %v652_v6 = vpop.f32.mrb[3].mxu1 }
 0x24c   :  { %v2046_v8 = vpop.f32.mrb[4].mxu1 }
 0x24d   :  { %v750_v10 = vmax.f32 %v2028_v3, %v2046_v8  ;;  %v730_v11 = vpop.f32.mrb[5].mxu1 }
 0x24e   :  { %v749_v12 = vmax.f32 %v642_v4, %v730_v11 }
 0x24f   :  { %v774_v13 = vadd.f32 %v761_v9, %v750_v10 }
 0x250   :  { %v773_v14 = vadd.f32 %v756_v7, %v749_v12  ;;  %v2049_v15 = vpop.f32.mrb[6].mxu1 }
 0x251   :  { %v752_v16 = vmax.f32 %v2031_v5, %v2049_v15  ;;  %v740_v17 = vpop.f32.mrb[7].mxu1  ;;  %v778_v22 = vmax.f32 %v774_v13, 0.0  ;;  %v1048_v15 = vld [vmem:[%s2661_s1 + $0x128] sm:$0xff] }
 0x252   :  { %v777_v19 = vmax.f32 %v773_v14, 0.0  ;;  %v751_v20 = vmax.f32 %v652_v6, %v740_v17  ;;  %v1050_v17 = vld [vmem:[%s2661_s1 + $0x138] sm:$0xff] }
 0x253   :  { %v776_v23 = vadd.f32 %v771_v18, %v752_v16  ;;  %v1049_v16 = vld [vmem:[%s2661_s1 + $0x130] sm:$0xff]  ;;  %v1193_v18 = vld [vmem:[%s2661_s1 + $0x140] sm:$0xff] }
 0x254   :  { %v775_v24 = vadd.f32 %v766_v21, %v751_v20  ;;  %2056 = vmatprep.mubr.msk.f32.mxu1 %vm789_vm6, %v777_v19  ;;  %v1329_v19 = vld [vmem:[%s2661_s1 + $0x190] sm:$0xff]  ;;  %v1330_v20 = vld [vmem:[%s2661_s1 + $0x198] sm:$0xff]  ;;  %v1331_v21 = vld [vmem:[%s2661_s1 + $0x1a0] sm:$0xff] }
 0x255   :  { %2057 = vmatmul.mubr.msk.f32.vlgmr.msra.gmra.mrb[8].mxu1 %vm789_vm6, %v778_v22  ;;  %v780_v26 = vmax.f32 %v776_v23, 0.0  ;;  %v2288_v22 = vmov 0.0|0.0   ;;  %v2220_v23 = vpack.c.bf16 %v1330_v20, %v1329_v19  ;;  %v1479_v19 = vld [vmem:[%s2661_s1 + $0x1b0] sm:$0xff]  ;;  %v1480_v20 = vld [vmem:[%s2661_s1 + $0x1b8] sm:$0xff] }
 0x256   :  { %v779_v25 = vmax.f32 %v775_v24, 0.0  ;;  %2063 = vmatpush3.msk.msra.mxu1 %vm905_vm5, %v891_v2  ;;  %v1332_v24 = vld [vmem:[%s2661_s1 + $0x1a8] sm:$0xff] }
 0x258   :  { %2059 = vmatprep.mubr.msk.f32.mxu1 %vm789_vm6, %v779_v25  ;;  %v2223_v25 = vpack.c.bf16 %v1332_v24, %v1331_v21  ;;  %v1716_v24 = vld [vmem:[%s2661_s1 + $0x228] sm:$0xff] }
 0x259   :  { %2060 = vmatmul.mubr.msk.f32.gmra.mrb[10].mxu1 %vm789_vm6, %v780_v26  ;;  %v1063_v26 = vpop.permute.xlu0 %1062 }
 0x328   :  { %v2058_v28 = vpop.f32.mrb[8].mxu1 }
 0x329   :  { %v874_v29 = vadd.f32 %v2058_v28, %v1839_v27  ;;  %v868_v30 = vpop.f32.mrb[9].mxu1 }
 0x32a   :  { %v869_v31 = vadd.f32 %v1839_v27, %v868_v30 }
 0x32b   :  { %v888_v34 = vmax.f32 %v874_v29, 0.0 }
 0x32c   :  { %v887_v32 = vmax.f32 %v869_v31, 0.0  ;;  %v2061_v33 = vpop.f32.mrb[10].mxu1 }
 0x32d   :  { %v884_v35 = vadd.f32 %v2061_v33, %v1839_v27  ;;  %v878_v36 = vpop.f32.mrb[11].mxu1  ;;  %v1073_v33 = vpop.permute.xlu0 %1072 }
 0x32e   :  { %v879_v37 = vadd.f32 %v1839_v27, %v878_v36  ;;  %2064 = vmatprep.mubr.msk.f32.mxu1 %vm892_vm7, %v887_v32  ;;  %v1058_v27 = vpop.permute.xlu1 %1057 }
 0x32f   :  { %2065 = vmatmul.mubr.msk.f32.vlgmr.msra.gmra.mrb[12].mxu1 %vm892_vm7, %v888_v34  ;;  %v890_v39 = vmax.f32 %v884_v35, 0.0 }
 0x330   :  { %v889_v38 = vmax.f32 %v879_v37, 0.0 }
 0x332   :  { %2067 = vmatprep.mubr.msk.f32.mxu1 %vm892_vm7, %v889_v38  ;;  %v1068_v36 = vpop.permute.xlu1 %1067 }
 0x333   :  { %2068 = vmatmul.mubr.msk.f32.gmra.mrb[14].mxu1 %vm892_vm7, %v890_v39 }
 0x334   :  { %2092 = vmatprep.mubr.msk.f32.mxu1 %vm1199_vm9, %v1193_v18 }
 0x402   :  { %v2066_v43 = vpop.f32.mrb[12].mxu1 }
 0x403   :  { %v1019_v45 = vmul.f32 %v2066_v43, %v1006_v41  ;;  %v975_v46 = vpop.f32.mrb[13].mxu1 }
 0x404   :  { %v1018_v48 = vmul.f32 %v1001_v42, %v975_v46 }
 0x405   :  { %v1027_v49 = vadd.f32 %v1023_v44, %v1019_v45 }
 0x406   :  { %v1026_v51 = vadd.f32 %v1022_v47, %v1018_v48  ;;  %v2069_v52 = vpop.f32.mrb[14].mxu1 }
 0x407   :  { %v1031_v55 = vadd.f32 3.0, %v1027_v49  ;;  %v1021_v56 = vmul.f32 %v2069_v52, %v1016_v50  ;;  %v985_v57 = vpop.f32.mrb[15].mxu1 }
 0x408   :  { %v1030_v59 = vadd.f32 3.0, %v1026_v51  ;;  %v1020_v60 = vmul.f32 %v1011_v54, %v985_v57 }
 0x409   :  { %v1035_v61 = vmax.f32 %v1031_v55, 0.0  ;;  %v1029_v62 = vadd.f32 %v1025_v53, %v1021_v56 }
 0x40a   :  { %v1034_v63 = vmax.f32 %v1030_v59, 0.0  ;;  %v1028_v0 = vadd.f32 %v1024_v58, %v1020_v60  ;;  %v1194_v60 = vld [vmem:[%s2661_s1 + $0x148] sm:$0xff] }
 0x40b   :  { %v1039_v1 = vmin.f32 %v1035_v61, 6.0  ;;  %v1033_v2 = vadd.f32 3.0, %v1029_v62  ;;  %v1195_v61 = vld [vmem:[%s2661_s1 + $0x150] sm:$0xff]  ;;  %v1196_v62 = vld [vmem:[%s2661_s1 + $0x158] sm:$0xff] }
 0x40c   :  { %v1038_v3 = vmin.f32 %v1034_v63, 6.0  ;;  %v1032_v4 = vadd.f32 3.0, %v1028_v0  ;;  %v1197_v63 = vld [vmem:[%s2661_s1 + $0x160] sm:$0xff]  ;;  %v1198_v0 = vld [vmem:[%s2661_s1 + $0x168] sm:$0xff] }
 0x40d   :  { %v1044_v5 = vmul.f32 0.16666667, %v1039_v1  ;;  %v1037_v6 = vmax.f32 %v1033_v2, 0.0  ;;  %v2290_v1 = vmov 0.0   ;;  %v1557_v2 = vld [vmem:[%s2661_s1 + $0x1d0] sm:$0xff] }
 0x40e   :  { %v1043_v7 = vmul.f32 0.16666667, %v1038_v3  ;;  %v1036_v8 = vmax.f32 %v1032_v4, 0.0  ;;  %v1558_v3 = vld [vmem:[%s2661_s1 + $0x1d8] sm:$0xff] }
 0x40f   :  { %v1041_v9 = vmin.f32 %v1037_v6, 6.0  ;;  %v2238_v4 = vpack.c.bf16 %v1558_v3, %v1557_v2  ;;  %v1560_v6 = vld [vmem:[%s2661_s1 + $0x1e8] sm:$0xff] }
 0x410   :  { %v1040_v10 = vmin.f32 %v1036_v8, 6.0  ;;  %v2199_v11 = vpack.c.bf16 %v1044_v5, %v1043_v7  ;;  %v1559_v5 = vld [vmem:[%s2661_s1 + $0x1e0] sm:$0xff]  ;;  %v1325_v8 = vld [vmem:[%s2661_s1 + $0x170] sm:$0xff] }
 0x411   :  { %v1046_v12 = vmul.f32 0.16666667, %v1041_v9  ;;  %v2241_v7 = vpack.c.bf16 %v1560_v6, %v1559_v5  ;;  %v1326_v9 = vld [vmem:[%s2661_s1 + $0x178] sm:$0xff] }
 0x412   :  { %v1045_v13 = vmul.f32 0.16666667, %v1040_v10  ;;  %2200 = vmatprep.subr.bf16.mxu0 %v2199_v11  ;;  %v2226_v10 = vpack.c.bf16 %v1326_v9, %v1325_v8 }
 0x413   :  { %2202 = vmatpush3.bf16.msra.mxu0 %v2199_v11  ;;  %v1327_v11 = vld [vmem:[%s2661_s1 + $0x180] sm:$0xff] }
 0x414   :  { %v2203_v14 = vpack.c.bf16 %v1046_v12, %v1045_v13  ;;  %v1328_v12 = vld [vmem:[%s2661_s1 + $0x188] sm:$0xff]  ;;  %v1713_v13 = vld [vmem:[%s2661_s1 + $0x210] sm:$0xff] }
 0x416   :  { %2204 = vmatprep.subr.bf16.mxu0 %v2203_v14 }
 0x417   :  { %2206 = vmatpush3.bf16.msra.mxu0 %v2203_v14  ;;  %v1714_v14 = vld [vmem:[%s2661_s1 + $0x218] sm:$0xff] }
 0x418   :  { %2219 = vmatprep.subr.bf16.mxu0 %v2288_v22  ;;  %v2250_v18 = vpack.c.bf16 %v1714_v14, %v1713_v13 }
 0x41a   :  { %2079 = vmatmul.mubr.msk.f32.vlgmr.msra.gmra.mrb[4].mxu0 %vm1075_vm8, %v1048_v15 }
 0x41b   :  { %2081 = vmatprep.mubr.msk.f32.mxu0 %vm1075_vm8, %v1049_v16  ;;  %2221 = vmatpush3.bf16.msra.mxu0 %v2220_v23  ;;  %v1715_v23 = vld [vmem:[%s2661_s1 + $0x220] sm:$0xff] }
 0x41c   :  { %2222 = vmatprep.subr.bf16.mxu0 %v2288_v22 }
 0x41e   :  { %2082 = vmatmul.mubr.msk.f32.gmra.mrb[6].mxu0 %vm1075_vm8, %v1050_v17  ;;  %v2229_v17 = vpack.c.bf16 %v1328_v12, %v1327_v11 }
 0x41f   :  { %2224 = vmatpush3.bf16.msra.mxu0 %v2223_v25  ;;  %2109 = vmatprep.mubr.msk.f32.mxu0 %vm2289_vm11, %v2290_v1 }
 0x420   :  { %2225 = vmatprep.subr.bf16.mxu0 %v2288_v22 }
 0x4ed   :  { %v2080_v28 = vpop.f32.mrb[4].mxu0 }
 0x4ee   :  { %v1160_v29 = vadd.f32 %v2080_v28, %v1063_v26  ;;  %v1154_v30 = vpop.f32.mrb[5].mxu0  ;;  %v2232_v26 = vpack.c.bf16 %v1480_v20, %v1479_v19  ;;  %v1482_v28 = vld [vmem:[%s2661_s1 + $0x1c8] sm:$0xff] }
 0x4ef   :  { %v1155_v31 = vadd.f32 %v1154_v30, %v1058_v27  ;;  %v1481_v27 = vld [vmem:[%s2661_s1 + $0x1c0] sm:$0xff] }
 0x4f0   :  { %v1174_v32 = vadd.f32 3.0, %v1160_v29 }
 0x4f1   :  { %v1173_v34 = vadd.f32 3.0, %v1155_v31  ;;  %v2083_v35 = vpop.f32.mrb[6].mxu0 }
 0x4f2   :  { %v1178_v37 = vmax.f32 %v1174_v32, 0.0  ;;  %v1170_v38 = vadd.f32 %v2083_v35, %v1073_v33  ;;  %v1164_v39 = vpop.f32.mrb[7].mxu0  ;;  %v2235_v32 = vpack.c.bf16 %v1482_v28, %v1481_v27  ;;  %v1635_v33 = vld [vmem:[%s2661_s1 + $0x1f0] sm:$0xff] }
 0x4f3   :  { %v1177_v40 = vmax.f32 %v1173_v34, 0.0  ;;  %v1165_v41 = vadd.f32 %v1164_v39, %v1068_v36  ;;  %v1636_v34 = vld [vmem:[%s2661_s1 + $0x1f8] sm:$0xff]  ;;  %v1637_v36 = vld [vmem:[%s2661_s1 + $0x200] sm:$0xff] }
 0x4f4   :  { %v1182_v42 = vmin.f32 %v1178_v37, 6.0  ;;  %v1176_v43 = vadd.f32 3.0, %v1170_v38  ;;  %v2244_v35 = vpack.c.bf16 %v1636_v34, %v1635_v33  ;;  %v1638_v37 = vld [vmem:[%s2661_s1 + $0x208] sm:$0xff] }
 0x4f5   :  { %v1181_v44 = vmin.f32 %v1177_v40, 6.0  ;;  %v1175_v45 = vadd.f32 3.0, %v1165_v41 }
 0x4f6   :  { %v1186_v46 = vmul.f32 0.16666667, %v1182_v42  ;;  %v1180_v47 = vmax.f32 %v1176_v43, 0.0 }
 0x4f7   :  { %v1185_v48 = vmul.f32 0.16666667, %v1181_v44  ;;  %v1179_v49 = vmax.f32 %v1175_v45, 0.0 }
 0x4f8   :  { %v1190_v50 = vmul.f32 %v1186_v46, %v1160_v29  ;;  %v1184_v51 = vmin.f32 %v1180_v47, 6.0  ;;  %v2253_v29 = vpack.c.bf16 %v1716_v24, %v1715_v23 }
 0x4f9   :  { %v1189_v52 = vmul.f32 %v1185_v48, %v1155_v31  ;;  %v1183_v53 = vmin.f32 %v1179_v49, 6.0 }
 0x4fa   :  { %v1188_v54 = vmul.f32 0.16666667, %v1184_v51 }
 0x4fb   :  { %v2207_v55 = vpack.c.bf16 %v1190_v50, %v1189_v52  ;;  %v1187_v56 = vmul.f32 0.16666667, %v1183_v53 }
 0x4fc   :  { %v1192_v57 = vmul.f32 %v1188_v54, %v1170_v38  ;;  %v2247_v38 = vpack.c.bf16 %v1638_v37, %v1637_v36 }
 0x4fd   :  { %v1191_v58 = vmul.f32 %v1187_v56, %v1165_v41  ;;  %2209 = vmatprep.subr.msk.bf16.mxu1 %vm2208_vm10, %v2207_v55 }
 0x4fe   :  { %2212 = vmatpush3.bf16.xpose.msk.msra.mxu1 %vm2208_vm10, %v2207_v55  ;;  %v1795_v55 = vpop.permute.xlu1 %1794 }
 0x4ff   :  { %v2213_v59 = vpack.c.bf16 %v1192_v57, %v1191_v58 }
 0x501   :  { %2215 = vmatprep.subr.msk.bf16.mxu1 %vm2208_vm10, %v2213_v59 }
 0x506   :  { %2218 = vmatpush3.bf16.xpose.msk.msra.mxu1 %vm2208_vm10, %v2213_v59 }
 0x507   :  { %2237 = vmatprep.subr.bf16.mxu1 %v2288_v22 }
 0x50d   :  { %2093 = vmatmul.mubr.msk.f32.vlgmr.msra.gmra.mrb[16].mxu1 %vm1199_vm9, %v1194_v60 }
 0x50e   :  { %2095 = vmatprep.mubr.msk.f32.mxu1 %vm1199_vm9, %v1195_v61  ;;  %2239 = vmatpush3.bf16.msra.mxu1 %v2238_v4 }
 0x50f   :  { %2240 = vmatprep.subr.bf16.mxu1 %v2288_v22 }
 0x511   :  { %2096 = vmatmul.mubr.msk.f32.gmra.mrb[18].mxu1 %vm1199_vm9, %v1196_v62 }
 0x512   :  { %2098 = vmatprep.mubr.msk.f32.mxu1 %vm1199_vm9, %v1197_v63  ;;  %2242 = vmatpush3.bf16.msra.mxu1 %v2241_v7 }
 0x513   :  { %2249 = vmatprep.subr.bf16.mxu1 %v2288_v22 }
 0x515   :  { %2099 = vmatmul.mubr.msk.f32.gmra.mrb[20].mxu1 %vm1199_vm9, %v1198_v0 }
 0x516   :  { %2142 = vmatprep.mubr.msk.f32.mxu1 %vm2289_vm11, %v2290_v1 }
 0x5e0   :  { %v2094_v15 = vpop.f32.mrb[16].mxu1 }
 0x5e1   :  { %v1296_v16 = vpop.f32.mrb[17].mxu1  ;;  %2110 = vmatmul.mubr.msk.f32.vlgmr.msra.gmra.mrb[8].mxu0 %vm1075_vm8, %v2094_v15 }
 0x5e2   :  { %2227 = vmatpush3.bf16.msra.mxu0 %v2226_v10  ;;  %2120 = vmatprep.mubr.msk.f32.mxu0 %vm2289_vm11, %v2290_v1 }
 0x5e3   :  { %2228 = vmatprep.subr.bf16.mxu0 %v2288_v22 }
 0x5e4   :  { %v2097_v21 = vpop.f32.mrb[18].mxu1 }
 0x5e5   :  { %v1306_v25 = vpop.f32.mrb[19].mxu1  ;;  %2143 = vmatmul.mubr.msk.f32.vlgmr.msra.gmra.mrb[22].mxu1 %vm1075_vm8, %v2097_v21 }
 0x5e6   :  { %2230 = vmatpush3.bf16.msra.mxu0 %v2229_v17  ;;  %2251 = vmatpush3.bf16.msra.mxu1 %v2250_v18 }
 0x5e7   :  { %2231 = vmatprep.subr.bf16.mxu0 %v2288_v22  ;;  %2252 = vmatprep.subr.bf16.mxu1 %v2288_v22 }
 0x5e8   :  { %v2100_v30 = vpop.f32.mrb[20].mxu1  ;;  %2164 = vmatprep.mubr.msk.f32.mxu1 %vm2289_vm11, %v2290_v1 }
 0x5e9   :  { %2121 = vmatmul.mubr.msk.f32.vlgmr.msra.gmra.mrb[10].mxu0 %vm1075_vm8, %v1296_v16  ;;  %v1316_v31 = vpop.f32.mrb[21].mxu1 }
 0x5ea   :  { %2233 = vmatpush3.bf16.msra.mxu0 %v2232_v26  ;;  %2131 = vmatprep.mubr.msk.f32.mxu0 %vm2289_vm11, %v2290_v1 }
 0x5eb   :  { %2234 = vmatprep.subr.bf16.mxu0 %v2288_v22  ;;  %2254 = vmatpush3.bf16.msra.mxu1 %v2253_v29 }
 0x5ee   :  { %2236 = vmatpush3.bf16.msra.mxu0 %v2235_v32  ;;  %2165 = vmatmul.mubr.msk.f32.vlgmr.msra.gmra.mrb[24].mxu1 %vm1075_vm8, %v2100_v30 }
 0x5ef   :  { %2243 = vmatprep.subr.bf16.mxu0 %v2288_v22 }
 0x5f1   :  { %2132 = vmatmul.mubr.msk.f32.vlgmr.msra.gmra.mrb[12].mxu0 %vm1075_vm8, %v1306_v25 }
 0x5f2   :  { %2245 = vmatpush3.bf16.msra.mxu0 %v2244_v35  ;;  %2153 = vmatprep.mubr.msk.f32.mxu0 %vm2289_vm11, %v2290_v1 }
 0x5f3   :  { %2246 = vmatprep.subr.bf16.mxu0 %v2288_v22 }
 0x5f6   :  { %2248 = vmatpush3.bf16.msra.mxu0 %v2247_v38 }
 0x5f9   :  { %2154 = vmatmul.mubr.msk.f32.vlgmr.msra.gmra.mrb[14].mxu0 %vm1075_vm8, %v1316_v31 }
 0x6b4   :  { %v1402_v39 = vpop.f32.mrb[8].mxu0 }
 0x6b5   :  { %v2111_v40 = vpop.f32.mrb[9].mxu0 }
 0x6b8   :  { %v1630_v41 = vpop.f32.mrb[22].mxu1 }
 0x6b9   :  { %v2144_v42 = vpop.f32.mrb[23].mxu1 }
 0x6bc   :  { %v1475_v43 = vpop.f32.mrb[10].mxu0 }
 0x6bd   :  { %v1476_v44 = vadd.f32 %v1475_v43, %v1402_v39  ;;  %v2122_v45 = vpop.f32.mrb[11].mxu0 }
 0x6c1   :  { %v1786_v46 = vpop.f32.mrb[24].mxu1 }
 0x6c2   :  { %v2166_v47 = vpop.f32.mrb[25].mxu1 }
 0x6c4   :  { %v1552_v48 = vpop.f32.mrb[12].mxu0 }
 0x6c5   :  { %v1556_v49 = vadd.f32 %v1552_v48, %v1476_v44  ;;  %v2133_v50 = vpop.f32.mrb[13].mxu0 }
 0x6c7   :  { %v1634_v51 = vadd.f32 %v1630_v41, %v1556_v49 }
 0x6cc   :  { %v1708_v52 = vpop.f32.mrb[14].mxu0 }
 0x6cd   :  { %v1712_v53 = vadd.f32 %v1708_v52, %v1634_v51  ;;  %v2155_v54 = vpop.f32.mrb[15].mxu0 }
 0x6cf   :  { %v1790_v22 = vadd.f32 %v1786_v46, %v1712_v53 }
 0x6d1   :  { %v1797_v56 = vadd.f32 %v1795_v55, %v1790_v22 }
 0x6d3   :  { %v1798_v57 = vadd.f32 3.0, %v1797_v56 }
 0x6d5   :  { %v1799_v58 = vmax.f32 %v1798_v57, 0.0 }
 0x6d7   :  { %v1800_v59 = vmin.f32 %v1799_v58, 6.0 }
 0x6d9   :  { %v1801_v60 = vmul.f32 0.16666667, %v1800_v59 }
 0x6db   :  { %v1802_v61 = vmul.f32 %v1801_v60, %v1797_v56 }
 0x6dd   :  { %1804 = vst.msk [vmem:[%s2662_s2] sm:$0xf] %vm1803_vm12, %v1802_v61 }

</bundles_post_ra>
